<compile_context>
chip_gen: v5e
topology: v5e:2x2
jax: 0.10.0
libtpu: 0.0.40
codegen_flags: <defaults>
</compile_context>

<pallas_src>
import jax
import jax.numpy as jnp
from jax.experimental import pallas as pl
from jax.experimental.pallas import tpu as pltpu

P = 128          # padded feature width (one lane tile)
N_LAYERS = 4


def mlp_kernel(x_ref, w_ref, b_ref, o_ref):
    # x_ref: (Bp, P)   w_ref: (4, P, P)   b_ref: (4, 1, P)   o_ref: (Bp, P)
    h = x_ref[...]
    for i in range(N_LAYERS - 1):
        h = jnp.maximum(
            jnp.dot(h, w_ref[i], preferred_element_type=jnp.float32) + b_ref[i],
            0.0)
    h = jnp.dot(h, w_ref[N_LAYERS - 1],
                preferred_element_type=jnp.float32) + b_ref[N_LAYERS - 1]
    o_ref[...] = h.astype(o_ref.dtype)


def pack_params(params):
    """Pack (w, b) pairs into one zero-padded weight slab and one bias slab.

    Weights are stored (in, out) so the kernel computes y = x @ W + b
    (matches PyTorch nn.Linear, which stores weight as (out, in)).
    Done once, outside the kernel call path.
    """
    assert len(params) == N_LAYERS
    w_slab = jnp.zeros((N_LAYERS, P, P), jnp.float32)
    b_slab = jnp.zeros((N_LAYERS, 1, P), jnp.float32)
    for i, (w, b) in enumerate(params):
        fi, fo = w.shape
        w_slab = w_slab.at[i, :fi, :fo].set(w.astype(jnp.float32))
        b_slab = b_slab.at[i, 0, :fo].set(b.reshape(-1).astype(jnp.float32))
    out_features = params[-1][0].shape[1]
    return w_slab, b_slab, out_features


def mlp_forward(x, w_slab, b_slab, out_features):
    B, in_features = x.shape
    Bp = max(8, ((B + 7) // 8) * 8)            # sublane-friendly batch

    x_pad = jnp.zeros((Bp, P), x.dtype).at[:B, :in_features].set(x)

    vmem_spec = pl.BlockSpec(memory_space=pltpu.MemorySpace.VMEM)

    out_pad = pl.pallas_call(
        mlp_kernel,
        out_shape=jax.ShapeDtypeStruct((Bp, P), x.dtype),
        in_specs=[vmem_spec, vmem_spec, vmem_spec],
        out_specs=vmem_spec,
    )(x_pad, w_slab, b_slab)

    return out_pad[:B, :out_features]


def init_params(key, in_features=4, h1=8, h2=9, h3=9, out_features=3):
    """Deterministic init mimicking nn.Linear's uniform(-1/sqrt(fan_in), ...)."""
    dims = [(in_features, h1), (h1, h2), (h2, h3), (h3, out_features)]
    params = []
    for (fan_in, fan_out) in dims:
        key, kw, kb = jax.random.split(key, 3)
        bound = 1.0 / (fan_in ** 0.5)
        w = jax.random.uniform(kw, (fan_in, fan_out), jnp.float32, -bound, bound)
        b = jax.random.uniform(kb, (1, fan_out), jnp.float32, -bound, bound)
        params.append((w, b))
    return params


def mlp_reference(x, params):
    h = x
    for i, (w, b) in enumerate(params):
        h = h @ w + b
        if i < len(params) - 1:
            h = jnp.maximum(h, 0.0)
    return h


if __name__ == "__main__":
    key = jax.random.PRNGKey(0)
    kx, kp = jax.random.split(key)

    batch = 8
    x = jax.random.normal(kx, (batch, 4), jnp.float32)
    params = init_params(kp)

    w_slab, b_slab, out_features = pack_params(params)   # packed once

    out = mlp_forward(x, w_slab, b_slab, out_features)
    jax.block_until_ready(out)

    ref = mlp_reference(x, params)
    assert out.shape == (batch, 3)
    assert jnp.allclose(out, ref, atol=1e-5, rtol=1e-5), "mismatch vs reference"

    print("KERNEL_OK")
</pallas_src>

<mosaic_0001>
module attributes {stable_mosaic.version = 11 : i64} {
  func.func @mlp_kernel(%arg0: memref<8x128xf32, #tpu.memory_space<vmem>>, %arg1: memref<4x128x128xf32, #tpu.memory_space<vmem>>, %arg2: memref<4x1x128xf32, #tpu.memory_space<vmem>>, %arg3: memref<8x128xf32, #tpu.memory_space<vmem>>) attributes {dimension_semantics = [], scalar_prefetch = 0 : i64, scratch_operands = 0 : i64, tpu.core_type = #tpu.core_type<tc>} {
    %c0 = arith.constant 0 : index
    %c0_0 = arith.constant 0 : index
    %0 = vector.load %arg0[%c0, %c0_0] : memref<8x128xf32, #tpu.memory_space<vmem>>, vector<8x128xf32>
    %c0_1 = arith.constant 0 : index
    %c0_2 = arith.constant 0 : index
    %c0_3 = arith.constant 0 : index
    %1 = vector.load %arg1[%c0_1, %c0_2, %c0_3] : memref<4x128x128xf32, #tpu.memory_space<vmem>>, vector<1x128x128xf32>
    %2 = vector.shape_cast %1 : vector<1x128x128xf32> to vector<128x128xf32>
    %cst = arith.constant dense<0.000000e+00> : vector<8x128xf32>
    %3 = tpu.matmul %0, %2, %cst {dimension_numbers = #tpu.dot_dimension_numbers<[1], [0], [0], [1], [0, 0, 1, 1], [], []>} : vector<8x128xf32>, vector<128x128xf32>, vector<8x128xf32> -> vector<8x128xf32>
    %c0_4 = arith.constant 0 : index
    %c0_5 = arith.constant 0 : index
    %c0_6 = arith.constant 0 : index
    %4 = vector.load %arg2[%c0_4, %c0_5, %c0_6] : memref<4x1x128xf32, #tpu.memory_space<vmem>>, vector<1x1x128xf32>
    %5 = vector.shape_cast %4 : vector<1x1x128xf32> to vector<1x128xf32>
    %6 = vector.broadcast %5 : vector<1x128xf32> to vector<8x128xf32>
    %7 = arith.addf %3, %6 : vector<8x128xf32>
    %cst_7 = arith.constant 0.000000e+00 : f32
    %8 = vector.broadcast %cst_7 : f32 to vector<8x128xf32>
    %9 = arith.maximumf %7, %8 : vector<8x128xf32>
    %c1 = arith.constant 1 : index
    %c0_8 = arith.constant 0 : index
    %c0_9 = arith.constant 0 : index
    %10 = vector.load %arg1[%c1, %c0_8, %c0_9] : memref<4x128x128xf32, #tpu.memory_space<vmem>>, vector<1x128x128xf32>
    %11 = vector.shape_cast %10 : vector<1x128x128xf32> to vector<128x128xf32>
    %cst_10 = arith.constant dense<0.000000e+00> : vector<8x128xf32>
    %12 = tpu.matmul %9, %11, %cst_10 {dimension_numbers = #tpu.dot_dimension_numbers<[1], [0], [0], [1], [0, 0, 1, 1], [], []>} : vector<8x128xf32>, vector<128x128xf32>, vector<8x128xf32> -> vector<8x128xf32>
    %c1_11 = arith.constant 1 : index
    %c0_12 = arith.constant 0 : index
    %c0_13 = arith.constant 0 : index
    %13 = vector.load %arg2[%c1_11, %c0_12, %c0_13] : memref<4x1x128xf32, #tpu.memory_space<vmem>>, vector<1x1x128xf32>
    %14 = vector.shape_cast %13 : vector<1x1x128xf32> to vector<1x128xf32>
    %15 = vector.broadcast %14 : vector<1x128xf32> to vector<8x128xf32>
    %16 = arith.addf %12, %15 : vector<8x128xf32>
    %cst_14 = arith.constant 0.000000e+00 : f32
    %17 = vector.broadcast %cst_14 : f32 to vector<8x128xf32>
    %18 = arith.maximumf %16, %17 : vector<8x128xf32>
    %c2 = arith.constant 2 : index
    %c0_15 = arith.constant 0 : index
    %c0_16 = arith.constant 0 : index
    %19 = vector.load %arg1[%c2, %c0_15, %c0_16] : memref<4x128x128xf32, #tpu.memory_space<vmem>>, vector<1x128x128xf32>
    %20 = vector.shape_cast %19 : vector<1x128x128xf32> to vector<128x128xf32>
    %cst_17 = arith.constant dense<0.000000e+00> : vector<8x128xf32>
    %21 = tpu.matmul %18, %20, %cst_17 {dimension_numbers = #tpu.dot_dimension_numbers<[1], [0], [0], [1], [0, 0, 1, 1], [], []>} : vector<8x128xf32>, vector<128x128xf32>, vector<8x128xf32> -> vector<8x128xf32>
    %c2_18 = arith.constant 2 : index
    %c0_19 = arith.constant 0 : index
    %c0_20 = arith.constant 0 : index
    %22 = vector.load %arg2[%c2_18, %c0_19, %c0_20] : memref<4x1x128xf32, #tpu.memory_space<vmem>>, vector<1x1x128xf32>
    %23 = vector.shape_cast %22 : vector<1x1x128xf32> to vector<1x128xf32>
    %24 = vector.broadcast %23 : vector<1x128xf32> to vector<8x128xf32>
    %25 = arith.addf %21, %24 : vector<8x128xf32>
    %cst_21 = arith.constant 0.000000e+00 : f32
    %26 = vector.broadcast %cst_21 : f32 to vector<8x128xf32>
    %27 = arith.maximumf %25, %26 : vector<8x128xf32>
    %c3 = arith.constant 3 : index
    %c0_22 = arith.constant 0 : index
    %c0_23 = arith.constant 0 : index
    %28 = vector.load %arg1[%c3, %c0_22, %c0_23] : memref<4x128x128xf32, #tpu.memory_space<vmem>>, vector<1x128x128xf32>
    %29 = vector.shape_cast %28 : vector<1x128x128xf32> to vector<128x128xf32>
    %cst_24 = arith.constant dense<0.000000e+00> : vector<8x128xf32>
    %30 = tpu.matmul %27, %29, %cst_24 {dimension_numbers = #tpu.dot_dimension_numbers<[1], [0], [0], [1], [0, 0, 1, 1], [], []>} : vector<8x128xf32>, vector<128x128xf32>, vector<8x128xf32> -> vector<8x128xf32>
    %c3_25 = arith.constant 3 : index
    %c0_26 = arith.constant 0 : index
    %c0_27 = arith.constant 0 : index
    %31 = vector.load %arg2[%c3_25, %c0_26, %c0_27] : memref<4x1x128xf32, #tpu.memory_space<vmem>>, vector<1x1x128xf32>
    %32 = vector.shape_cast %31 : vector<1x1x128xf32> to vector<1x128xf32>
    %33 = vector.broadcast %32 : vector<1x128xf32> to vector<8x128xf32>
    %34 = arith.addf %30, %33 : vector<8x128xf32>
    %c0_28 = arith.constant 0 : index
    %c0_29 = arith.constant 0 : index
    %35 = vector.load %arg3[%c0_28, %c0_29] : memref<8x128xf32, #tpu.memory_space<vmem>>, vector<8x128xf32>
    tpu.vector_store %arg3[%c0_28, %c0_29], %34 {strides = array<i32>} : memref<8x128xf32, #tpu.memory_space<vmem>>, vector<8x128xf32>,
    return
  }
}

</mosaic_0001>

<bundles_post_ra>
// kernel: tpu_custom_call.1
= control target key start
LH: loop header
LB: loop body
LE: loop exit
PB: predicated region body
PF: predicated region fallthrough
CT: control target
= control target key end

     0   :  { %8 = vsyncpa [#allocation3], 0  ;;  %s403_s0 = inlined_call_operand.hbm [shape: f32[8,128], index: 0, kind: input, shape index: {}]   ;;  %s404_s1 = inlined_call_operand.hbm [shape: f32[4,128,128], index: 1, kind: input, shape index: {}]   ;;  %s405_s2 = inlined_call_operand.hbm [shape: f32[4,1,128], index: 2, kind: input, shape index: {}]   ;;  %s406_s3 = inlined_call_operand.hbm [shape: f32[8,128], index: 3, kind: output, shape index: {}]  }
   0x1   :  { %9 = vsyncpa [#allocation6], 0  ;;  %s26_s14 = sshll.u32 %s404_s1, 4  ;;  %s27_s14 = int_to_ptr.hbm [resolvable:$true] %s26_s14 }
   0x2   :  { %10 = vsyncpa [#allocation4], 0  ;;  %s363_s15 = smov [#allocation5]   ;;  %s16_s19 = sshll.u32 %s403_s0, 4  ;;  %s17_s19 = int_to_ptr.hbm [resolvable:$true] %s16_s19 }
   0x3   :  { %s28_s16 = sshll.u32 %s363_s15, 4  ;;  %s364_s20 = smov 128   ;;  %s29_s16 = int_to_ptr.vmem [resolvable:$true] %s28_s16 }
   0x4   :  { %s365_s21 = smov 8   ;;  %s366_s22 = smov [#allocation2]  }
   0x5   :  { %34 = dma.hbm_to_vmem [thread:$0]  %s27_s14, 8192, %s29_s16, [#allocation6], %s364_s20, %s364_s20, %s365_s21  }
   0x6   :  { %s18_s23 = sshll.u32 %s366_s22, 4  ;;  %s39_s26 = sshll.u32 %s405_s2, 4  ;;  %s19_s23 = int_to_ptr.vmem [resolvable:$true] %s18_s23  ;;  %s40_s26 = int_to_ptr.hbm [resolvable:$true] %s39_s26 }
   0x7   :  { %21 = dma.hbm_to_vmem [thread:$0]  %s17_s19, 128, %s19_s23, [#allocation3]  }
   0x8   :  { %s367_s1 = smov [#allocation7]   ;;  %s368_s28 = smov 16  }
   0x9   :  { %s41_s27 = sshll.u32 %s367_s1, 4  ;;  %s369_s29 = smov 1   ;;  %s42_s27 = int_to_ptr.vmem [resolvable:$true] %s41_s27 }
   0xa   :  { %47 = dma.hbm_to_vmem [thread:$0]  %s40_s26, 64, %s42_s27, [#allocation6], %s368_s28, %s368_s28, %s369_s29  }
   0xb   :  { %357 = dma.done.wait [#allocation3], 128  }
   0xc   :  { %358 = vsyncadd [#allocation3], 4294967168 }
   0xd   :  { %359 = dma.done.wait [#allocation6], 8256  }
   0xe   :  { %360 = vsyncadd [#allocation6], 4294959040  ;;  %v76_v0 = vld [vmem:[#allocation5 + $0x78] sm:$0xff]  ;;  %v75_v1 = vld [vmem:[#allocation5 + $0x70] sm:$0xff]  ;;  %s370_s0 = smov [#allocation8]   ;;  %s238_s5 = sshll.u32 %s406_s3, 4  ;;  %s239_s5 = int_to_ptr.hbm [resolvable:$true] %s238_s5 }
   0xf   :  { %81 = vmatpush.msra.mxu0 %v76_v0  ;;  %v74_v2 = vld [vmem:[#allocation5 + $0x68] sm:$0xff]  ;;  %v73_v3 = vld [vmem:[#allocation5 + $0x60] sm:$0xff]  ;;  %v118_v4 = vld [vmem:[#allocation5 + $0xf8] sm:$0xff]  ;;  %s236_s2 = sshll.u32 %s370_s0, 4  ;;  %s237_s2 = int_to_ptr.vmem [resolvable:$true] %s236_s2 }
  0x10   :  { %v72_v5 = vld [vmem:[#allocation5 + $0x58] sm:$0xff]  ;;  %124 = vmatpush.msra.mxu1 %v118_v4  ;;  %v117_v6 = vld [vmem:[#allocation5 + $0xf0] sm:$0xff]  ;;  %v116_v7 = vld [vmem:[#allocation5 + $0xe8] sm:$0xff] }
  0x11   :  { %82 = vmatpush.msra.mxu0 %v75_v1  ;;  %v71_v8 = vld [vmem:[#allocation5 + $0x50] sm:$0xff]  ;;  %v115_v9 = vld [vmem:[#allocation5 + $0xe0] sm:$0xff]  ;;  %v70_v10 = vld [vmem:[#allocation5 + $0x48] sm:$0xff] }
  0x12   :  { %125 = vmatpush.msra.mxu1 %v117_v6  ;;  %v114_v11 = vld [vmem:[#allocation5 + $0xd8] sm:$0xff]  ;;  %v69_v12 = vld [vmem:[#allocation5 + $0x40] sm:$0xff]  ;;  %v113_v13 = vld [vmem:[#allocation5 + $0xd0] sm:$0xff] }
  0x13   :  { %83 = vmatpush.msra.mxu0 %v74_v2  ;;  %v68_v14 = vld [vmem:[#allocation5 + $0x38] sm:$0xff]  ;;  %v112_v15 = vld [vmem:[#allocation5 + $0xc8] sm:$0xff]  ;;  %v67_v16 = vld [vmem:[#allocation5 + $0x30] sm:$0xff] }
  0x14   :  { %126 = vmatpush.msra.mxu1 %v116_v7  ;;  %v111_v17 = vld [vmem:[#allocation5 + $0xc0] sm:$0xff]  ;;  %v66_v18 = vld [vmem:[#allocation5 + $0x28] sm:$0xff]  ;;  %v110_v19 = vld [vmem:[#allocation5 + $0xb8] sm:$0xff] }
  0x15   :  { %84 = vmatpush.msra.mxu0 %v73_v3  ;;  %v65_v20 = vld [vmem:[#allocation5 + $0x20] sm:$0xff]  ;;  %v109_v21 = vld [vmem:[#allocation5 + $0xb0] sm:$0xff]  ;;  %v64_v22 = vld [vmem:[#allocation5 + $0x18] sm:$0xff] }
  0x16   :  { %127 = vmatpush.msra.mxu1 %v115_v9  ;;  %v108_v23 = vld [vmem:[#allocation5 + $0xa8] sm:$0xff]  ;;  %v63_v24 = vld [vmem:[#allocation5 + $0x10] sm:$0xff]  ;;  %v107_v25 = vld [vmem:[#allocation5 + $0xa0] sm:$0xff] }
  0x17   :  { %85 = vmatpush.msra.mxu0 %v72_v5  ;;  %v62_v26 = vld [vmem:[#allocation5 + $0x8] sm:$0xff]  ;;  %v106_v27 = vld [vmem:[#allocation5 + $0x98] sm:$0xff]  ;;  %v61_v28 = vld [vmem:[#allocation5] sm:$0xff] }
  0x18   :  { %128 = vmatpush.msra.mxu1 %v114_v11  ;;  %v60_v29 = vld [vmem:[#allocation2] sm:$0xff]  ;;  %v105_v30 = vld [vmem:[#allocation5 + $0x90] sm:$0xff]  ;;  %v104_v31 = vld [vmem:[#allocation5 + $0x88] sm:$0xff] }
  0x19   :  { %86 = vmatpush.msra.mxu0 %v71_v8  ;;  %v103_v32 = vld [vmem:[#allocation5 + $0x80] sm:$0xff]  ;;  %v161_v33 = vld [vmem:[#allocation5 + $0x178] sm:$0xff]  ;;  %v160_v34 = vld [vmem:[#allocation5 + $0x170] sm:$0xff] }
  0x1a   :  { %129 = vmatpush.msra.mxu1 %v113_v13  ;;  %167 = vmatpush.msra.mxu2 %v161_v33  ;;  %v159_v35 = vld [vmem:[#allocation5 + $0x168] sm:$0xff]  ;;  %v158_v36 = vld [vmem:[#allocation5 + $0x160] sm:$0xff]  ;;  %v157_v37 = vld [vmem:[#allocation5 + $0x158] sm:$0xff] }
  0x1b   :  { %87 = vmatpush.msra.mxu0 %v70_v10  ;;  %v156_v38 = vld [vmem:[#allocation5 + $0x150] sm:$0xff]  ;;  %v155_v39 = vld [vmem:[#allocation5 + $0x148] sm:$0xff]  ;;  %v154_v40 = vld [vmem:[#allocation5 + $0x140] sm:$0xff] }
  0x1c   :  { %130 = vmatpush.msra.mxu1 %v112_v15  ;;  %168 = vmatpush.msra.mxu2 %v160_v34  ;;  %v153_v41 = vld [vmem:[#allocation5 + $0x138] sm:$0xff]  ;;  %v152_v42 = vld [vmem:[#allocation5 + $0x130] sm:$0xff]  ;;  %v151_v43 = vld [vmem:[#allocation5 + $0x128] sm:$0xff] }
  0x1d   :  { %88 = vmatpush.msra.mxu0 %v69_v12  ;;  %v150_v44 = vld [vmem:[#allocation5 + $0x120] sm:$0xff]  ;;  %v149_v45 = vld [vmem:[#allocation5 + $0x118] sm:$0xff]  ;;  %v148_v50 = vld [vmem:[#allocation5 + $0x110] sm:$0xff] }
  0x1e   :  { %131 = vmatpush.msra.mxu1 %v111_v17  ;;  %169 = vmatpush.msra.mxu2 %v159_v35  ;;  %v257_v46 = vld [vmem:[#allocation7] ss:$0 sm:$0xff]  ;;  %v147_v51 = vld [vmem:[#allocation5 + $0x108] sm:$0xff]  ;;  %v204_v53 = vld [vmem:[#allocation5 + $0x1f8] sm:$0xff] }
  0x1f   :  { %89 = vmatpush.msra.mxu0 %v68_v14  ;;  %v146_v52 = vld [vmem:[#allocation5 + $0x100] sm:$0xff]  ;;  %v203_v54 = vld [vmem:[#allocation5 + $0x1f0] sm:$0xff]  ;;  %210 = vmatpush.msra.mxu3 %v204_v53  ;;  %v202_v55 = vld [vmem:[#allocation5 + $0x1e8] sm:$0xff] }
  0x20   :  { %132 = vmatpush.msra.mxu1 %v110_v19  ;;  %170 = vmatpush.msra.mxu2 %v158_v36  ;;  %v201_v56 = vld [vmem:[#allocation5 + $0x1e0] sm:$0xff]  ;;  %v200_v57 = vld [vmem:[#allocation5 + $0x1d8] sm:$0xff]  ;;  %v199_v58 = vld [vmem:[#allocation5 + $0x1d0] sm:$0xff] }
  0x21   :  { %90 = vmatpush.msra.mxu0 %v67_v16  ;;  %211 = vmatpush.msra.mxu3 %v203_v54  ;;  %v198_v59 = vld [vmem:[#allocation5 + $0x1c8] sm:$0xff]  ;;  %v197_v60 = vld [vmem:[#allocation5 + $0x1c0] sm:$0xff]  ;;  %v196_v61 = vld [vmem:[#allocation5 + $0x1b8] sm:$0xff] }
  0x22   :  { %133 = vmatpush.msra.mxu1 %v109_v21  ;;  %171 = vmatpush.msra.mxu2 %v157_v37  ;;  %v195_v62 = vld [vmem:[#allocation5 + $0x1b0] sm:$0xff]  ;;  %v194_v63 = vld [vmem:[#allocation5 + $0x1a8] sm:$0xff]  ;;  %v193_v0 = vld [vmem:[#allocation5 + $0x1a0] sm:$0xff] }
  0x23   :  { %91 = vmatpush.msra.mxu0 %v66_v18  ;;  %212 = vmatpush.msra.mxu3 %v202_v55  ;;  %v192_v1 = vld [vmem:[#allocation5 + $0x198] sm:$0xff]  ;;  %v258_v2 = vld [vmem:[#allocation7 + $0x1] ss:$0 sm:$0xff]  ;;  %v191_v6 = vld [vmem:[#allocation5 + $0x190] sm:$0xff] }
  0x24   :  { %134 = vmatpush.msra.mxu1 %v108_v23  ;;  %172 = vmatpush.msra.mxu2 %v156_v38  ;;  %v190_v7 = vld [vmem:[#allocation5 + $0x188] sm:$0xff]  ;;  %v189_v8 = vld [vmem:[#allocation5 + $0x180] sm:$0xff] }
  0x25   :  { %92 = vmatpush.msra.mxu0 %v65_v20  ;;  %213 = vmatpush.msra.mxu3 %v201_v56  ;;  %v259_v9 = vld [vmem:[#allocation7 + $0x2] ss:$0 sm:$0xff]  ;;  %v260_v13 = vld [vmem:[#allocation7 + $0x3] ss:$0 sm:$0xff] }
  0x26   :  { %135 = vmatpush.msra.mxu1 %v107_v25  ;;  %173 = vmatpush.msra.mxu2 %v155_v39 }
  0x27   :  { %93 = vmatpush.msra.mxu0 %v64_v22  ;;  %214 = vmatpush.msra.mxu3 %v200_v57 }
  0x28   :  { %136 = vmatpush.msra.mxu1 %v106_v27  ;;  %174 = vmatpush.msra.mxu2 %v154_v40 }
  0x29   :  { %94 = vmatpush.msra.mxu0 %v63_v24  ;;  %215 = vmatpush.msra.mxu3 %v199_v58 }
  0x2a   :  { %137 = vmatpush.msra.mxu1 %v105_v30  ;;  %175 = vmatpush.msra.mxu2 %v153_v41 }
  0x2b   :  { %95 = vmatpush.msra.mxu0 %v62_v26  ;;  %216 = vmatpush.msra.mxu3 %v198_v59 }
  0x2c   :  { %138 = vmatpush.msra.mxu1 %v104_v31  ;;  %176 = vmatpush.msra.mxu2 %v152_v42 }
  0x2d   :  { %96 = vmatpush.msra.mxu0 %v61_v28  ;;  %217 = vmatpush.msra.mxu3 %v197_v60 }
  0x2e   :  { %97 = vmatmul.f32.vlgmr.msra.gmra.mxu0 %v60_v29  ;;  %139 = vmatpush.msra.mxu1 %v103_v32 }
  0x2f   :  { %177 = vmatpush.msra.mxu2 %v151_v43  ;;  %218 = vmatpush.msra.mxu3 %v196_v61 }
  0x31   :  { %178 = vmatpush.msra.mxu2 %v150_v44  ;;  %219 = vmatpush.msra.mxu3 %v195_v62 }
  0x33   :  { %179 = vmatpush.msra.mxu2 %v149_v45  ;;  %220 = vmatpush.msra.mxu3 %v194_v63 }
  0x35   :  { %180 = vmatpush.msra.mxu2 %v148_v50  ;;  %221 = vmatpush.msra.mxu3 %v193_v0 }
  0x37   :  { %181 = vmatpush.msra.mxu2 %v147_v51  ;;  %222 = vmatpush.msra.mxu3 %v192_v1 }
  0x39   :  { %182 = vmatpush.msra.mxu2 %v146_v52  ;;  %223 = vmatpush.msra.mxu3 %v191_v6 }
  0x3b   :  { %224 = vmatpush.msra.mxu3 %v190_v7 }
  0x3d   :  { %225 = vmatpush.msra.mxu3 %v189_v8 }
  0xab   :  { %v98_v47 = vpop.f32.mrf.mxu0 }
  0xac   :  { %v99_v48 = vadd.f32 %v257_v46, %v98_v47 }
  0xae   :  { %v101_v49 = vmax.f32 %v99_v48, 0.0 }
  0xb0   :  { %140 = vmatmul.f32.vlgmr.msra.gmra.mxu1 %v101_v49 }
 0x12d   :  { %v141_v3 = vpop.f32.mrf.mxu1 }
 0x12e   :  { %v142_v4 = vadd.f32 %v258_v2, %v141_v3 }
 0x130   :  { %v144_v5 = vmax.f32 %v142_v4, 0.0 }
 0x132   :  { %183 = vmatmul.f32.vlgmr.msra.gmra.mxu2 %v144_v5 }
 0x1b5   :  { %v184_v10 = vpop.f32.mrf.mxu2 }
 0x1b6   :  { %v185_v11 = vadd.f32 %v259_v9, %v184_v10 }
 0x1b8   :  { %v187_v12 = vmax.f32 %v185_v11, 0.0 }
 0x1ba   :  { %226 = vmatmul.f32.vlgmr.msra.gmra.mxu3 %v187_v12 }
 0x23d   :  { %v227_v14 = vpop.f32.mrf.mxu3 }
 0x23e   :  { %v228_v15 = vadd.f32 %v260_v13, %v227_v14 }
 0x240   :  { %230 = vst [vmem:[#allocation8] sm:$0xff] %v228_v15 }
 0x241   :  { %241 = dma.vmem_to_hbm [thread:$0]  %s237_s2, 128, %s239_s5, [#allocation4]  }
 0x242   :  { %361 = dma.done.wait [#allocation4], 128  }
 0x243   :  { %362 = vsyncadd [#allocation4], 4294967168 }
 0x244   :  { %246 = vsyncpa [#allocation3], 1 }
 0x245   :  { %247 = vsyncpa [#allocation6], 1 }
 0x246   :  { %248 = vsyncpa [#allocation4], 1 }

</bundles_post_ra>
